<compile_context>
chip_gen: v6e
topology: v6e:2x2x1
jax: 0.10.0
libtpu: 0.0.40
codegen_flags: <defaults>
</compile_context>

<pallas_src>
import functools

import jax
import jax.numpy as jnp
from jax.experimental import pallas as pl
from jax.experimental.pallas import tpu as pltpu

_SUBLANE = 8
_LANE = 128
_VMEM_LIMIT_BYTES = 32 << 20       # scoped-VMEM request: safe on v5e/v6e/v7x
_TILE_VMEM_BUDGET = 24 << 20       # headroom under the 32 MiB scoped limit
_TB_CAP = 4096                     # >=512-row tiles already hit ~85% HBM roofline


def _choose_tb(B, D_in, D_out):
    """Pick the batch tile.

    Largest multiple of 8 that (double-buffered, f32 in-row + out-row) fits the
    VMEM budget, capped at _TB_CAP.  Batches that fit in one step but are still
    sizable get split into two steps so a 2-TC chip (v7x) has both cores busy
    on the 'parallel' grid axis.
    """
    bytes_per_row = 4 * (D_in + D_out)                             # f32 x row + out row
    fit = max(_SUBLANE, _TILE_VMEM_BUDGET // (2 * bytes_per_row))  # 2x: double buffer
    cap = min(_TB_CAP, fit)
    cap -= cap % _SUBLANE
    cap = max(cap, _SUBLANE)

    if B <= cap:
        # Single step is fine for small B; split for megacore only when each
        # half is still a large (>=512-row) tile.
        if B % 2 == 0 and B // 2 >= 512:
            return B // 2
        return B

    # Large batch: largest divisor of B that is a multiple of 8 and <= cap.
    tb = cap
    while tb >= _SUBLANE:
        if B % tb == 0:
            return tb
        tb -= _SUBLANE
    # Fallback (B has no multiple-of-8 divisor <= cap): largest divisor <= cap.
    tb = cap
    while tb > 1 and B % tb:
        tb -= 1
    return tb


def _head_kernel(x_ref, w1_ref, b1_ref, w2_ref, b2_ref, o_ref, *, packed_rows):
    # x_ref:  (tb, D_in)
    # w1_ref: (D_in, D_bot)   b1_ref: (1, D_bot)
    # w2_ref: (D_bot, D_out)  b2_ref: (1, D_out)
    # o_ref:  (tb, D_out)                  if packed_rows is None
    #         (tb*D_out//128, 128)         otherwise (lane-dense store)
    h = jnp.dot(x_ref[...], w1_ref[...], preferred_element_type=jnp.float32)
    h = jnp.maximum(h + b1_ref[...], 0.0)                    # dense -> ReLU
    # TODO(synk): nn.Dropout(final_dropout) is identity in eval mode; training-mode
    # dropout (pltpu.prng_seed + prng_random_bits masking) intentionally omitted.
    # TODO(synk): optional layernorm=True branch of the module is not implemented
    # (default construction has layernorm=False).
    y = jnp.dot(h, w2_ref[...], preferred_element_type=jnp.float32) + b2_ref[...]
    # NOTE: at D_bot~16-150 / D_out=2 the second matmul uses a sliver of the MXU;
    # the MXU is otherwise idle and not on the critical path, so it stays there.
    if packed_rows is None:
        o_ref[...] = y.astype(o_ref.dtype)
    else:
        # (tb, D_out) row-major is bit-identical to (tb*D_out//128, 128):
        # relayout rides the idle XLU so the store is a full unmasked vst.
        o_ref[...] = y.reshape(packed_rows, _LANE).astype(o_ref.dtype)


def classification_head(x, w1, b1, w2, b2, *, tb=None, interpret=False):
    """x: (B, D_in) f32.  w1: (D_in, D_bot), b1: (1, D_bot), w2: (D_bot, D_out),
    b2: (1, D_out) — i.e. PyTorch Linear weights already transposed to (in, out)."""
    B, D_in = x.shape
    D_in2, D_bot = w1.shape
    D_bot2, D_out = w2.shape
    assert D_in2 == D_in and D_bot2 == D_bot
    assert b1.shape == (1, D_bot) and b2.shape == (1, D_out)

    if tb is None:
        tb = _choose_tb(B, D_in, D_out)
    assert B % tb == 0, "batch must be divisible by the batch tile"
    grid = (B // tb,)

    # Lane-dense output path (guarded: requires tb*D_out to be a lane multiple).
    packed = (tb * D_out) % _LANE == 0
    if packed:
        packed_rows = (tb * D_out) // _LANE
        out_shape = jax.ShapeDtypeStruct((B * D_out // _LANE, _LANE), x.dtype)
        out_spec = pl.BlockSpec((packed_rows, _LANE), lambda i: (i, 0))
    else:
        packed_rows = None
        out_shape = jax.ShapeDtypeStruct((B, D_out), x.dtype)
        out_spec = pl.BlockSpec((tb, D_out), lambda i: (i, 0))

    flops = 2 * B * D_bot * (D_in + D_out)
    bytes_accessed = 4 * (B * (D_in + D_out)              # x in, y out
                          + D_in * D_bot + D_bot * D_out  # weights
                          + D_bot + D_out)                # biases

    out = pl.pallas_call(
        functools.partial(_head_kernel, packed_rows=packed_rows),
        out_shape=out_shape,
        grid=grid,
        in_specs=[
            pl.BlockSpec((tb, D_in), lambda i: (i, 0)),      # x tile (pipelined)
            pl.BlockSpec((D_in, D_bot), lambda i: (0, 0)),   # W1 (constant block -> resident)
            pl.BlockSpec((1, D_bot), lambda i: (0, 0)),      # b1 (resident)
            pl.BlockSpec((D_bot, D_out), lambda i: (0, 0)),  # W2 (resident)
            pl.BlockSpec((1, D_out), lambda i: (0, 0)),      # b2 (resident)
        ],
        out_specs=out_spec,
        compiler_params=pltpu.CompilerParams(
            dimension_semantics=("parallel",),               # batch steps -> v7x's 2 TCs
            vmem_limit_bytes=_VMEM_LIMIT_BYTES,
        ),
        cost_estimate=pl.CostEstimate(
            flops=flops, transcendentals=0, bytes_accessed=bytes_accessed),
        interpret=interpret,
    )(x, w1, b1, w2, b2)

    if packed:
        out = out.reshape(B, D_out)   # free: row-major bit-identical view
    return out


def _ref(x, w1, b1, w2, b2):
    h = jnp.maximum(x @ w1 + b1, 0.0)
    return h @ w2 + b2


if __name__ == "__main__":
    # Small shapes consistent with the module's forward:
    # ClassificationHead(input_size=32, bottleneck=16, output_size=2)
    batch, input_size, bottleneck, output_size = 8, 32, 16, 2

    key = jax.random.PRNGKey(0)
    kx, kw1, kb1, kw2, kb2 = jax.random.split(key, 5)

    x = jax.random.normal(kx, (batch, input_size), dtype=jnp.float32)

    # Deterministic synthetic parameters (PyTorch Linear: W (out,in), b (out,)),
    # stored pre-transposed as (in, out) for the kernel.
    w1 = jax.random.normal(kw1, (input_size, bottleneck), dtype=jnp.float32) * 0.05
    b1 = jax.random.normal(kb1, (1, bottleneck), dtype=jnp.float32) * 0.01
    w2 = jax.random.normal(kw2, (bottleneck, output_size), dtype=jnp.float32) * 0.05
    b2 = jax.random.normal(kb2, (1, output_size), dtype=jnp.float32) * 0.01

    # ---- Compiled TPU run at the small demo shape (unpacked-store path). ----
    out = jax.block_until_ready(classification_head(x, w1, b1, w2, b2))
    ref = _ref(x, w1, b1, w2, b2)
    assert out.shape == (batch, output_size)
    assert jnp.allclose(out, ref, atol=1e-5, rtol=1e-5), "mismatch vs JAX reference"

    # ---- Interpret-mode check of the large-batch, lane-dense (packed-store)
    # path so the packing/index arithmetic is verified without a big workload.
    big_batch = 2048  # -> tb=1024 (2 grid steps), tb*D_out % 128 == 0 -> packed store
    xb = jax.random.normal(kx, (big_batch, input_size), dtype=jnp.float32)
    outb = classification_head(xb, w1, b1, w2, b2, interpret=True)
    refb = _ref(xb, w1, b1, w2, b2)
    assert outb.shape == (big_batch, output_size)
    assert jnp.allclose(outb, refb, atol=1e-4, rtol=1e-4), "packed-path mismatch"

    print("KERNEL_OK")
</pallas_src>

<mosaic_0001>
module attributes {stable_mosaic.version = 11 : i64} {
  func.func @_head_kernel(%arg0: i32, %arg1: memref<8x32xf32, #tpu.memory_space<vmem>>, %arg2: memref<32x16xf32, #tpu.memory_space<vmem>>, %arg3: memref<1x16xf32, #tpu.memory_space<vmem>>, %arg4: memref<16x2xf32, #tpu.memory_space<vmem>>, %arg5: memref<1x2xf32, #tpu.memory_space<vmem>>, %arg6: memref<8x2xf32, #tpu.memory_space<vmem>>) attributes {dimension_semantics = [#tpu.dimension_semantics<parallel>], iteration_bounds = array<i64: 1>, scalar_prefetch = 0 : i64, scratch_operands = 0 : i64, tpu.core_type = #tpu.core_type<tc>, window_params = [{transform_indices = @transform_0, window_bounds = array<i64: 8, 32>}, {pipeline_mode = #tpu.pipeline_mode<synchronous>, transform_indices = @transform_1, window_bounds = array<i64: 32, 16>}, {pipeline_mode = #tpu.pipeline_mode<synchronous>, transform_indices = @transform_2, window_bounds = array<i64: 1, 16>}, {pipeline_mode = #tpu.pipeline_mode<synchronous>, transform_indices = @transform_3, window_bounds = array<i64: 16, 2>}, {pipeline_mode = #tpu.pipeline_mode<synchronous>, transform_indices = @transform_4, window_bounds = array<i64: 1, 2>}, {transform_indices = @transform_5, window_bounds = array<i64: 8, 2>}]} {
    %c0 = arith.constant 0 : index
    %c0_0 = arith.constant 0 : index
    %0 = vector.load %arg1[%c0, %c0_0] : memref<8x32xf32, #tpu.memory_space<vmem>>, vector<8x32xf32>
    %c0_1 = arith.constant 0 : index
    %c0_2 = arith.constant 0 : index
    %1 = vector.load %arg2[%c0_1, %c0_2] : memref<32x16xf32, #tpu.memory_space<vmem>>, vector<32x16xf32>
    %cst = arith.constant dense<0.000000e+00> : vector<8x16xf32>
    %2 = tpu.matmul %0, %1, %cst {dimension_numbers = #tpu.dot_dimension_numbers<[1], [0], [0], [1], [0, 0, 1, 1], [], []>} : vector<8x32xf32>, vector<32x16xf32>, vector<8x16xf32> -> vector<8x16xf32>
    %c0_3 = arith.constant 0 : index
    %c0_4 = arith.constant 0 : index
    %3 = vector.load %arg3[%c0_3, %c0_4] : memref<1x16xf32, #tpu.memory_space<vmem>>, vector<1x16xf32>
    %4 = vector.broadcast %3 : vector<1x16xf32> to vector<8x16xf32>
    %5 = arith.addf %2, %4 : vector<8x16xf32>
    %cst_5 = arith.constant 0.000000e+00 : f32
    %6 = vector.broadcast %cst_5 : f32 to vector<8x16xf32>
    %7 = arith.maximumf %5, %6 : vector<8x16xf32>
    %c0_6 = arith.constant 0 : index
    %c0_7 = arith.constant 0 : index
    %8 = vector.load %arg4[%c0_6, %c0_7] : memref<16x2xf32, #tpu.memory_space<vmem>>, vector<16x2xf32>
    %cst_8 = arith.constant dense<0.000000e+00> : vector<8x2xf32>
    %9 = tpu.matmul %7, %8, %cst_8 {dimension_numbers = #tpu.dot_dimension_numbers<[1], [0], [0], [1], [0, 0, 1, 1], [], []>} : vector<8x16xf32>, vector<16x2xf32>, vector<8x2xf32> -> vector<8x2xf32>
    %c0_9 = arith.constant 0 : index
    %c0_10 = arith.constant 0 : index
    %10 = vector.load %arg5[%c0_9, %c0_10] : memref<1x2xf32, #tpu.memory_space<vmem>>, vector<1x2xf32>
    %11 = vector.broadcast %10 : vector<1x2xf32> to vector<8x2xf32>
    %12 = arith.addf %9, %11 : vector<8x2xf32>
    %c0_11 = arith.constant 0 : index
    %c0_12 = arith.constant 0 : index
    %13 = vector.load %arg6[%c0_11, %c0_12] : memref<8x2xf32, #tpu.memory_space<vmem>>, vector<8x2xf32>
    tpu.vector_store %arg6[%c0_11, %c0_12], %12 {strides = array<i32>} : memref<8x2xf32, #tpu.memory_space<vmem>>, vector<8x2xf32>,
    return
  }
  func.func @transform_0(%arg0: i32) -> (i32, i32) {
    %c0_i32 = arith.constant 0 : i32
    %c0_i32_0 = arith.constant 0 : i32
    return %arg0, %c0_i32 : i32, i32
  }
  func.func @transform_1(%arg0: i32) -> (i32, i32) {
    %c0_i32 = arith.constant 0 : i32
    %c0_i32_0 = arith.constant 0 : i32
    %c0_i32_1 = arith.constant 0 : i32
    return %c0_i32, %c0_i32_0 : i32, i32
  }
  func.func @transform_2(%arg0: i32) -> (i32, i32) {
    %c0_i32 = arith.constant 0 : i32
    %c0_i32_0 = arith.constant 0 : i32
    %c0_i32_1 = arith.constant 0 : i32
    return %c0_i32, %c0_i32_0 : i32, i32
  }
  func.func @transform_3(%arg0: i32) -> (i32, i32) {
    %c0_i32 = arith.constant 0 : i32
    %c0_i32_0 = arith.constant 0 : i32
    %c0_i32_1 = arith.constant 0 : i32
    return %c0_i32, %c0_i32_0 : i32, i32
  }
  func.func @transform_4(%arg0: i32) -> (i32, i32) {
    %c0_i32 = arith.constant 0 : i32
    %c0_i32_0 = arith.constant 0 : i32
    %c0_i32_1 = arith.constant 0 : i32
    return %c0_i32, %c0_i32_0 : i32, i32
  }
  func.func @transform_5(%arg0: i32) -> (i32, i32) {
    %c0_i32 = arith.constant 0 : i32
    %c0_i32_0 = arith.constant 0 : i32
    return %arg0, %c0_i32 : i32, i32
  }
}

</mosaic_0001>

<bundles_post_ra>
// kernel: tpu_custom_call.1
= control target key start
LH: loop header
LB: loop body
LE: loop exit
PB: predicated region body
PF: predicated region fallthrough
CT: control target
= control target key end

     0   :  { %v228_v0 = vmov 0.0   ;;  %vm229_vm0 = vmmov 0   ;;  %vm32_vm1 = vcmask 261120   ;;  %vm116_vm2 = vcmask 130048   ;;  %s290_s1 = inlined_call_operand.vmem [shape: f32[32,16], index: 1, kind: input, shape index: {}]   ;;  %s291_s0 = inlined_call_operand.vmem [shape: f32[8,32], index: 0, kind: input, shape index: {}]   ;;  %s292_s3 = inlined_call_operand.vmem [shape: f32[16,2], index: 3, kind: input, shape index: {}]   ;;  %s293_s2 = inlined_call_operand.vmem [shape: f32[1,16], index: 2, kind: input, shape index: {}]   ;;  %s294_s4 = inlined_call_operand.vmem [shape: f32[1,2], index: 4, kind: input, shape index: {}]   ;;  %s295_s5 = inlined_call_operand.vmem [shape: f32[8,2], index: 5, kind: output, shape index: {}]  }
   0x1   :  { %208 = vmatprep.subr.mxu0 %v228_v0  ;;  %v24_v1 = vld [vmem:[%s290_s1 + $0x18] sm:$0xff]  ;;  %v23_v2 = vld [vmem:[%s290_s1 + $0x10] sm:$0xff]  ;;  %216 = vmatprep.mubr.msk.f32.mxu0 %vm229_vm0, %v228_v0  ;;  %v22_v3 = vld [vmem:[%s290_s1 + $0x8] sm:$0xff]  ;;  %vm190_vm3 = vcmask 15360  }
   0x2   :  { %209 = vmatpush3.msra.mxu0 %v24_v1  ;;  %219 = vmatprep.subr.mxu1 %v228_v0  ;;  %v21_v4 = vld [vmem:[%s290_s1] sm:$0xff]  ;;  %v108_v6 = vld [vmem:[%s292_s3 + $0x8] sm:$0xff] }
   0x3   :  { %210 = vmatprep.subr.mxu0 %v228_v0  ;;  %223 = vmatprep.mubr.msk.f32.mxu1 %vm229_vm0, %v228_v0  ;;  %v20_v5 = vld [vmem:[%s291_s0] sm:$0xff] }
   0x4   :  { %211 = vmatpush3.msra.mxu0 %v23_v2  ;;  %220 = vmatpush3.msra.mxu1 %v108_v6  ;;  %v107_v7 = vld [vmem:[%s292_s3] sm:$0xff] }
   0x5   :  { %212 = vmatprep.subr.mxu0 %v228_v0  ;;  %221 = vmatprep.subr.mxu1 %v228_v0  ;;  %v196_v8 = vld [vmem:[%s293_s2] ss:$0 sm:$0xff] }
   0x6   :  { %213 = vmatpush3.msra.mxu0 %v22_v3  ;;  %222 = vmatpush3.msra.mxu1 %v107_v7  ;;  %v198_v13 = vld [vmem:[%s294_s4] ss:$0 sm:$0xff] }
   0x7   :  { %214 = vmatprep.subr.mxu0 %v228_v0 }
   0x8   :  { %215 = vmatpush3.msra.mxu0 %v21_v4 }
   0x9   :  { %217 = vmatmul.mubr.msk.f32.vlgmr.msra.gmra.mxu0 %vm32_vm1, %v20_v5 }
  0xc9   :  { %v102_v9 = vpop.f32.mrf.mxu0 }
  0xca   :  { %v103_v10 = vadd.f32 %v196_v8, %v102_v9 }
  0xcb   :  { %v218_v11 = vpop.f32.mrf.mxu0 }
  0xcc   :  { %v106_v12 = vmax.f32 %v103_v10, 0.0 }
  0xce   :  { %224 = vmatmul.mubr.msk.f32.vlgmr.msra.gmra.mxu1 %vm116_vm2, %v106_v12 }
 0x18e   :  { %v186_v14 = vpop.f32.mrf.mxu1 }
 0x18f   :  { %v187_v15 = vadd.f32 %v198_v13, %v186_v14 }
 0x190   :  { %v225_v16 = vpop.f32.mrf.mxu1 }
 0x191   :  { %191 = vst.msk [vmem:[%s295_s5] sm:$0xff] %vm190_vm3, %v187_v15 }

</bundles_post_ra>
